<compile_context>
chip_gen: v7x
topology: tpu7x:2x2x1
jax: 0.10.0
libtpu: 0.0.40
codegen_flags: <defaults>
</compile_context>

<pallas_src>
import functools

import jax
import jax.numpy as jnp
from jax.experimental import pallas as pl
from jax.experimental.pallas import tpu as pltpu


# --------------------------------------------------------------------------------------
# Small helpers
# --------------------------------------------------------------------------------------

def _round_up(n, m):
    return -(-n // m) * m


def _pick_tm(M, cap):
    """Row-tile size: multiple of 16 (bf16 MXU LHS), grid length >= 2 when M allows
    (v7x dual TensorCore), capped so tiles stay comfortably inside VMEM."""
    if M >= 2 * cap:
        return cap
    tm = _round_up(max(-(-M // 2), 16), 16)
    return min(tm, cap)


def _custom_layernorm(z, a, b, eps):
    # Annotated-Transformer LayerNorm (NOT torch.nn.LayerNorm):
    #   a * (z - mean) / (std_unbiased + eps) + b ; std uses the D-1 divisor and eps is
    #   added to std (not variance).  Keep as-is — it matches the PyTorch spec above.
    d = z.shape[-1]
    mean = jnp.mean(z, axis=-1, keepdims=True)
    zc = z - mean
    var = jnp.sum(zc * zc, axis=-1, keepdims=True) * (1.0 / (d - 1))
    inv = 1.0 / (jnp.sqrt(var) + eps)          # (tm,1) operand — exact divide is ~free
    return a * (zc * inv) + b


# --------------------------------------------------------------------------------------
# Pallas kernels
# --------------------------------------------------------------------------------------

def _ffn_sublayer_connection_kernel(x_ref, w1_ref, b1_ref, w2_ref, vec_ref, o_ref, *, eps):
    """Fused:  LayerNorm(x + FFN(x))  for one (tm, D) row tile.

    vec_ref rows: 0 = b2, 1 = a_2 (LN scale), 2 = b_2 (LN bias); each broadcast (1, D).
    w1_ref / w2_ref are already bf16 (pre-cast in the wrapper, VMEM-resident via constant
    index_maps)."""
    x = x_ref[...]                                            # (tm, D) f32
    vecs = vec_ref[...]                                       # (3, D)  f32
    b2 = vecs[0:1, :]
    ln_a = vecs[1:2, :]
    ln_b = vecs[2:3, :]
    # sublayer(x) = relu(x @ w1 + b1) @ w2 + b2 — bf16 MXU operands, f32 accumulate.
    h = jnp.dot(x.astype(jnp.bfloat16), w1_ref[...],
                preferred_element_type=jnp.float32) + b1_ref[...]
    h = jnp.maximum(h, 0.0)                                   # ReLU in f32 (VPU)
    y = jnp.dot(h.astype(jnp.bfloat16), w2_ref[...],
                preferred_element_type=jnp.float32) + b2
    # dropout == identity (eval), residual add, post-LayerNorm
    z = x + y
    o_ref[...] = _custom_layernorm(z, ln_a, ln_b, eps).astype(o_ref.dtype)


def _add_norm_kernel(x_ref, y_ref, ab_ref, o_ref, *, eps):
    """Fused:  LayerNorm(x + y)  — generic path for an arbitrary precomputed sublayer(x).
    ab_ref rows: 0 = a_2 (LN scale), 1 = b_2 (LN bias)."""
    z = x_ref[...] + y_ref[...]
    ab = ab_ref[...]
    o_ref[...] = _custom_layernorm(z, ab[0:1, :], ab[1:2, :], eps).astype(o_ref.dtype)


# --------------------------------------------------------------------------------------
# Wrappers
# --------------------------------------------------------------------------------------

def sublayer_connection_ffn(x, w1, b1, w2, b2, a, b, *, eps=1e-6, tm=None):
    """SublayerConnection with a position-wise FFN sublayer, fully fused in one
    pallas_call (matmuls + bias + ReLU + residual + custom LayerNorm stay in VMEM).

    NOTE: matmuls use bf16 MXU operands with f32 accumulation — not bit-exact vs an
    all-f32 reference (intended trade-off)."""
    B, T, D = x.shape
    d_ff = w1.shape[1]
    M = B * T
    if tm is None:
        tm = _pick_tm(M, cap=512)
    M_pad = _round_up(M, tm)

    x2 = x.reshape(M, D).astype(jnp.float32)
    if M_pad != M:
        x2 = jnp.pad(x2, ((0, M_pad - M), (0, 0)))            # padded rows sliced off below

    w1_b = w1.astype(jnp.bfloat16)                            # pre-cast once (halves DMA)
    w2_b = w2.astype(jnp.bfloat16)
    b1_2 = b1.reshape(1, d_ff).astype(jnp.float32)
    vecs = jnp.stack([b2, a, b]).astype(jnp.float32)          # (3, D): one DMA descriptor

    # Explicit VMEM budget: double-buffered tiles + bf16-resident weights + headroom.
    need = 2 * (2 * tm * D * 4                                # x tile + out tile (f32)
                + D * d_ff * 2 + d_ff * D * 2                 # bf16 weights
                + d_ff * 4 + 3 * D * 4)                       # b1 + stacked vectors
    need += 4 * tm * d_ff * 4                                 # intermediate h / scratch
    vmem_limit = int(min(max(need + (4 << 20), 16 << 20), 48 << 20))

    out = pl.pallas_call(
        functools.partial(_ffn_sublayer_connection_kernel, eps=eps),
        out_shape=jax.ShapeDtypeStruct((M_pad, D), jnp.float32),
        grid=(M_pad // tm,),
        in_specs=[
            pl.BlockSpec((tm, D), lambda i: (i, 0)),          # x row tile
            pl.BlockSpec((D, d_ff), lambda i: (0, 0)),        # w1 (bf16, VMEM-resident)
            pl.BlockSpec((1, d_ff), lambda i: (0, 0)),        # b1
            pl.BlockSpec((d_ff, D), lambda i: (0, 0)),        # w2 (bf16, VMEM-resident)
            pl.BlockSpec((3, D), lambda i: (0, 0)),           # [b2; a_2; b_2]
        ],
        out_specs=pl.BlockSpec((tm, D), lambda i: (i, 0)),
        compiler_params=pltpu.CompilerParams(
            dimension_semantics=("parallel",),
            vmem_limit_bytes=vmem_limit),
    )(x2, w1_b, b1_2, w2_b, vecs)
    return out[:M].reshape(B, T, D)


def sublayer_connection(x, sublayer, a, b, *, eps=1e-6, tm=None, out_dtype=None):
    """Generic SublayerConnection: `sublayer` is any JAX callable (same feature size).
    The residual add + custom LayerNorm are fused into a single Pallas kernel.
    Pass out_dtype=jnp.bfloat16 to halve writeback bytes if the consumer accepts it."""
    y = sublayer(x)                                           # arbitrary sublayer (JAX)
    B, T, D = x.shape
    M = B * T
    if tm is None:
        tm = _pick_tm(M, cap=1024)                            # purely memory-bound path
    M_pad = _round_up(M, tm)
    out_dtype = x.dtype if out_dtype is None else out_dtype

    x2 = x.reshape(M, D).astype(jnp.float32)
    y2 = y.reshape(M, D).astype(jnp.float32)
    if M_pad != M:
        pad = ((0, M_pad - M), (0, 0))
        x2 = jnp.pad(x2, pad)
        y2 = jnp.pad(y2, pad)
    ab = jnp.stack([a, b]).astype(jnp.float32)                # (2, D)

    need = 2 * (3 * tm * D * 4 + 2 * D * 4) + (4 << 20)
    vmem_limit = int(min(max(need, 16 << 20), 48 << 20))

    out = pl.pallas_call(
        functools.partial(_add_norm_kernel, eps=eps),
        out_shape=jax.ShapeDtypeStruct((M_pad, D), out_dtype),
        grid=(M_pad // tm,),
        in_specs=[
            pl.BlockSpec((tm, D), lambda i: (i, 0)),
            pl.BlockSpec((tm, D), lambda i: (i, 0)),
            pl.BlockSpec((2, D), lambda i: (0, 0)),
        ],
        out_specs=pl.BlockSpec((tm, D), lambda i: (i, 0)),
        compiler_params=pltpu.CompilerParams(
            dimension_semantics=("parallel",),
            vmem_limit_bytes=vmem_limit),
    )(x2, y2, ab)
    return out[:M].reshape(B, T, D)


# --------------------------------------------------------------------------------------
# Pure-JAX references (match the PyTorch module semantics exactly, f32)
# --------------------------------------------------------------------------------------

def _layernorm_ref(z, a, b, eps=1e-6):
    mean = jnp.mean(z, axis=-1, keepdims=True)
    std = jnp.sqrt(jnp.var(z, axis=-1, ddof=1, keepdims=True))   # torch .std() default
    return a * (z - mean) / (std + eps) + b


def _ffn_ref(x, w1, b1, w2, b2):
    h = jnp.maximum(x @ w1 + b1, 0.0)
    return h @ w2 + b2


# --------------------------------------------------------------------------------------

if __name__ == "__main__":
    B, T, D, D_FF = 2, 64, 128, 512          # lane-dense feature dims (multiples of 128)

    root = jax.random.PRNGKey(0)
    k_x, k_w1, k_w2, k_a, k_b, k_ws = jax.random.split(root, 6)

    x = jax.random.normal(k_x, (B, T, D), jnp.float32)
    w1 = 0.05 * jax.random.normal(k_w1, (D, D_FF), jnp.float32)
    b1 = jnp.zeros((D_FF,), jnp.float32)
    w2 = 0.05 * jax.random.normal(k_w2, (D_FF, D), jnp.float32)
    b2 = jnp.zeros((D,), jnp.float32)
    a_2 = 1.0 + 0.1 * jax.random.normal(k_a, (D,), jnp.float32)  # LayerNorm scale
    b_2 = 0.1 * jax.random.normal(k_b, (D,), jnp.float32)        # LayerNorm bias

    # ---- fully fused path: SublayerConnection with an FFN sublayer ----
    fused = jax.jit(sublayer_connection_ffn)
    out = fused(x, w1, b1, w2, b2, a_2, b_2)
    jax.block_until_ready(out)
    ref = _layernorm_ref(x + _ffn_ref(x, w1, b1, w2, b2), a_2, b_2)
    assert out.shape == (B, T, D) and out.dtype == jnp.float32
    assert bool(jnp.all(jnp.isfinite(out)))
    assert bool(jnp.allclose(out, ref, atol=3e-2, rtol=3e-2))    # bf16 MXU operands

    # ---- generic path: arbitrary sublayer callable, fused residual + LayerNorm ----
    ws = 0.1 * jax.random.normal(k_ws, (D, D), jnp.float32)
    sub = lambda t: jnp.tanh(t @ ws)
    gen = jax.jit(lambda t: sublayer_connection(t, sub, a_2, b_2))
    out2 = gen(x)
    jax.block_until_ready(out2)
    ref2 = _layernorm_ref(x + sub(x), a_2, b_2)
    assert out2.shape == (B, T, D) and out2.dtype == jnp.float32
    assert bool(jnp.allclose(out2, ref2, atol=1e-4, rtol=1e-4))  # f32 all the way

    # ---- ragged row count: exercises pl.cdiv-style padding (no divisibility assert) ----
    Tr = 50                                                      # M = 100, not a tm multiple
    xr = jax.random.normal(k_x, (B, Tr, D), jnp.float32)
    out3 = jax.jit(sublayer_connection_ffn)(xr, w1, b1, w2, b2, a_2, b_2)
    jax.block_until_ready(out3)
    ref3 = _layernorm_ref(xr + _ffn_ref(xr, w1, b1, w2, b2), a_2, b_2)
    assert out3.shape == (B, Tr, D)
    assert bool(jnp.allclose(out3, ref3, atol=3e-2, rtol=3e-2))

    print("KERNEL_OK")
</pallas_src>

<mosaic_0001>
module attributes {stable_mosaic.version = 11 : i64} {
  func.func @_ffn_sublayer_connection_kernel(%arg0: i32, %arg1: memref<64x128xf32, #tpu.memory_space<vmem>>, %arg2: memref<128x512xbf16, #tpu.memory_space<vmem>>, %arg3: memref<1x512xf32, #tpu.memory_space<vmem>>, %arg4: memref<512x128xbf16, #tpu.memory_space<vmem>>, %arg5: memref<3x128xf32, #tpu.memory_space<vmem>>, %arg6: memref<64x128xf32, #tpu.memory_space<vmem>>) attributes {dimension_semantics = [#tpu.dimension_semantics<parallel>], iteration_bounds = array<i64: 2>, scalar_prefetch = 0 : i64, scratch_operands = 0 : i64, tpu.core_type = #tpu.core_type<tc>, window_params = [{transform_indices = @transform_0, window_bounds = array<i64: 64, 128>}, {pipeline_mode = #tpu.pipeline_mode<synchronous>, transform_indices = @transform_1, window_bounds = array<i64: 128, 512>}, {pipeline_mode = #tpu.pipeline_mode<synchronous>, transform_indices = @transform_2, window_bounds = array<i64: 1, 512>}, {pipeline_mode = #tpu.pipeline_mode<synchronous>, transform_indices = @transform_3, window_bounds = array<i64: 512, 128>}, {pipeline_mode = #tpu.pipeline_mode<synchronous>, transform_indices = @transform_4, window_bounds = array<i64: 3, 128>}, {transform_indices = @transform_5, window_bounds = array<i64: 64, 128>}]} {
    %c0 = arith.constant 0 : index
    %c0_0 = arith.constant 0 : index
    %0 = vector.load %arg1[%c0, %c0_0] : memref<64x128xf32, #tpu.memory_space<vmem>>, vector<64x128xf32>
    %c0_1 = arith.constant 0 : index
    %c0_2 = arith.constant 0 : index
    %1 = vector.load %arg5[%c0_1, %c0_2] : memref<3x128xf32, #tpu.memory_space<vmem>>, vector<3x128xf32>
    %2 = vector.extract_strided_slice %1 {offsets = [0, 0], sizes = [1, 128], strides = [1, 1]} : vector<3x128xf32> to vector<1x128xf32>
    %3 = vector.extract_strided_slice %1 {offsets = [1, 0], sizes = [1, 128], strides = [1, 1]} : vector<3x128xf32> to vector<1x128xf32>
    %4 = vector.extract_strided_slice %1 {offsets = [2, 0], sizes = [1, 128], strides = [1, 1]} : vector<3x128xf32> to vector<1x128xf32>
    %5 = arith.truncf %0 : vector<64x128xf32> to vector<64x128xbf16>
    %c0_3 = arith.constant 0 : index
    %c0_4 = arith.constant 0 : index
    %6 = vector.load %arg2[%c0_3, %c0_4] : memref<128x512xbf16, #tpu.memory_space<vmem>>, vector<128x512xbf16>
    %cst = arith.constant dense<0.000000e+00> : vector<64x512xf32>
    %7 = tpu.matmul %5, %6, %cst {dimension_numbers = #tpu.dot_dimension_numbers<[1], [0], [0], [1], [0, 0, 1, 1], [], []>} : vector<64x128xbf16>, vector<128x512xbf16>, vector<64x512xf32> -> vector<64x512xf32>
    %c0_5 = arith.constant 0 : index
    %c0_6 = arith.constant 0 : index
    %8 = vector.load %arg3[%c0_5, %c0_6] : memref<1x512xf32, #tpu.memory_space<vmem>>, vector<1x512xf32>
    %9 = vector.broadcast %8 : vector<1x512xf32> to vector<64x512xf32>
    %10 = arith.addf %7, %9 : vector<64x512xf32>
    %cst_7 = arith.constant 0.000000e+00 : f32
    %11 = vector.broadcast %cst_7 : f32 to vector<64x512xf32>
    %12 = arith.maximumf %10, %11 : vector<64x512xf32>
    %13 = arith.truncf %12 : vector<64x512xf32> to vector<64x512xbf16>
    %c0_8 = arith.constant 0 : index
    %c0_9 = arith.constant 0 : index
    %14 = vector.load %arg4[%c0_8, %c0_9] : memref<512x128xbf16, #tpu.memory_space<vmem>>, vector<512x128xbf16>
    %cst_10 = arith.constant dense<0.000000e+00> : vector<64x128xf32>
    %15 = tpu.matmul %13, %14, %cst_10 {dimension_numbers = #tpu.dot_dimension_numbers<[1], [0], [0], [1], [0, 0, 1, 1], [], []>} : vector<64x512xbf16>, vector<512x128xbf16>, vector<64x128xf32> -> vector<64x128xf32>
    %16 = vector.broadcast %2 : vector<1x128xf32> to vector<64x128xf32>
    %17 = arith.addf %15, %16 : vector<64x128xf32>
    %18 = arith.addf %0, %17 : vector<64x128xf32>
    %cst_11 = arith.constant dense<0.000000e+00> : vector<64xf32>
    %19 = vector.multi_reduction <add>, %18, %cst_11 [1] : vector<64x128xf32> to vector<64xf32>
    %20 = vector.shape_cast %19 : vector<64xf32> to vector<64x1xf32>
    %cst_12 = arith.constant 1.280000e+02 : f32
    %21 = vector.broadcast %cst_12 : f32 to vector<64x1xf32>
    %22 = arith.divf %20, %21 : vector<64x1xf32>
    %23 = vector.broadcast %22 : vector<64x1xf32> to vector<64x128xf32>
    %24 = arith.subf %18, %23 : vector<64x128xf32>
    %25 = arith.mulf %24, %24 : vector<64x128xf32>
    %cst_13 = arith.constant dense<0.000000e+00> : vector<64xf32>
    %26 = vector.multi_reduction <add>, %25, %cst_13 [1] : vector<64x128xf32> to vector<64xf32>
    %27 = vector.shape_cast %26 : vector<64xf32> to vector<64x1xf32>
    %cst_14 = arith.constant 0.00787401571 : f32
    %28 = vector.broadcast %cst_14 : f32 to vector<64x1xf32>
    %29 = arith.mulf %27, %28 : vector<64x1xf32>
    %30 = math.sqrt %29 : vector<64x1xf32>
    %cst_15 = arith.constant 9.99999997E-7 : f32
    %31 = vector.broadcast %cst_15 : f32 to vector<64x1xf32>
    %32 = arith.addf %30, %31 : vector<64x1xf32>
    %cst_16 = arith.constant 1.000000e+00 : f32
    %33 = vector.broadcast %cst_16 : f32 to vector<64x1xf32>
    %34 = arith.divf %33, %32 : vector<64x1xf32>
    %35 = vector.broadcast %34 : vector<64x1xf32> to vector<64x128xf32>
    %36 = arith.mulf %24, %35 : vector<64x128xf32>
    %37 = vector.broadcast %3 : vector<1x128xf32> to vector<64x128xf32>
    %38 = arith.mulf %37, %36 : vector<64x128xf32>
    %39 = vector.broadcast %4 : vector<1x128xf32> to vector<64x128xf32>
    %40 = arith.addf %38, %39 : vector<64x128xf32>
    %c0_17 = arith.constant 0 : index
    %c0_18 = arith.constant 0 : index
    %41 = vector.load %arg6[%c0_17, %c0_18] : memref<64x128xf32, #tpu.memory_space<vmem>>, vector<64x128xf32>
    tpu.vector_store %arg6[%c0_17, %c0_18], %40 {strides = array<i32>} : memref<64x128xf32, #tpu.memory_space<vmem>>, vector<64x128xf32>,
    return
  }
  func.func @transform_0(%arg0: i32) -> (i32, i32) {
    %c0_i32 = arith.constant 0 : i32
    %c0_i32_0 = arith.constant 0 : i32
    return %arg0, %c0_i32 : i32, i32
  }
  func.func @transform_1(%arg0: i32) -> (i32, i32) {
    %c0_i32 = arith.constant 0 : i32
    %c0_i32_0 = arith.constant 0 : i32
    %c0_i32_1 = arith.constant 0 : i32
    return %c0_i32, %c0_i32_0 : i32, i32
  }
  func.func @transform_2(%arg0: i32) -> (i32, i32) {
    %c0_i32 = arith.constant 0 : i32
    %c0_i32_0 = arith.constant 0 : i32
    %c0_i32_1 = arith.constant 0 : i32
    return %c0_i32, %c0_i32_0 : i32, i32
  }
  func.func @transform_3(%arg0: i32) -> (i32, i32) {
    %c0_i32 = arith.constant 0 : i32
    %c0_i32_0 = arith.constant 0 : i32
    %c0_i32_1 = arith.constant 0 : i32
    return %c0_i32, %c0_i32_0 : i32, i32
  }
  func.func @transform_4(%arg0: i32) -> (i32, i32) {
    %c0_i32 = arith.constant 0 : i32
    %c0_i32_0 = arith.constant 0 : i32
    %c0_i32_1 = arith.constant 0 : i32
    return %c0_i32, %c0_i32_0 : i32, i32
  }
  func.func @transform_5(%arg0: i32) -> (i32, i32) {
    %c0_i32 = arith.constant 0 : i32
    %c0_i32_0 = arith.constant 0 : i32
    return %arg0, %c0_i32 : i32, i32
  }
}

</mosaic_0001>

<bundles_post_ra>
// kernel: sublayer_connection_ffn.1
= control target key start
LH: loop header
LB: loop body
LE: loop exit
PB: predicated region body
PF: predicated region fallthrough
CT: control target
= control target key end

     0   :  { %10 = vsyncpa [#allocation3], 0  ;;  %s2218_s0 = inlined_call_operand.vmem [shape: f32[128,128], index: 0, kind: input, shape index: {}]   ;;  %s2219_s1 = inlined_call_operand.vmem [shape: bf16[128,512], index: 1, kind: input, shape index: {}]   ;;  %s2220_s2 = inlined_call_operand.vmem [shape: f32[1,512], index: 2, kind: input, shape index: {}]   ;;  %s2221_s3 = inlined_call_operand.vmem [shape: bf16[512,128], index: 3, kind: input, shape index: {}]   ;;  %s2222_s4 = inlined_call_operand.vmem [shape: f32[3,128], index: 4, kind: input, shape index: {}]   ;;  %s2223_s5 = inlined_call_operand.hbm [shape: f32[128,128], index: 5, kind: output, shape index: {}]  }
   0x1   :  { %12 = vsyncpa [#allocation3 + $0x1], 0  ;;  %s1716_s18 = smov 0   ;;  %s1718_s19 = smov 0  }
   0x2   :  { %s1720_s20 = smov 0   ;;  %s1722_s21 = smov 0  }
   0x3 LB: > { %s1737_s22 = sadd.s32 4294967295, %s1680_s21   ;;  %s1307_s23 = sadd.s32 4294967294, %s1680_s21   ;;  %s1680_s21 = sphi %s1722_s21, %s2229_s21   ;;  %s1676_s20 = sphi %s1720_s20, %s2228_s20   ;;  %s1672_s19 = sphi %s1718_s19, %s2227_s19   ;;  %s1668_s18 = sphi %s1716_s18, %s2226_s18  }
   0x4   : > { %s1741_s24 = sadd.s32 1, %s1680_s21   ;;  %s135_s25 = sadd.s32 1, %s1676_s20 }
   0x5   : > { %s132_s26 = ssub.s32 %s1680_s21, %s1741_s24  ;;  %p145_p0 = scmp.ne.s32.totalorder %s1676_s20, %s1672_s19 }
   0x6   : > { %p133_p1 = scmp.eq.s32.totalorder %s132_s26, 0  ;;  %p146_p2 = scmp.eq.s32.totalorder %s1737_s22, 1 }
   0x7   : > { %p151_p3 = scmp.ne.s32.totalorder %s1672_s19, %s1668_s18  ;;  %p152_p4 = scmp.eq.s32.totalorder %s1307_s23, 1 }
   0x8   : > { %s1752_s27 = scalar_select %p133_p1, %s1676_s20, %s135_s25  }
   0x9   : > { %p1754_p5 = por %p146_p2, %p145_p0  ;;  %p1758_p6 = por %p152_p4, %p151_p3 }
   0xa   : > { %p1310_p7 = scmp.ge.s32.totalorder %s1680_s21, 1  ;;  %p191_p8 = scmp.lt.s32.totalorder %s1680_s21, 3 }
   0xc   : > { %p192_p9 = pnand %p1310_p7, %p191_p8 }
   0xd   : > { %v1506_v0 = vld [vmem:[%s2219_s1 + $0x4] ss:$16 sps:$4 sm:$0xff] (!%p192_p9)   ;;  %v1508_v1 = vld [vmem:[%s2219_s1 + $0xc] ss:$16 sps:$4 sm:$0xff] (!%p192_p9)   ;;  %v1682_v2 = vmov (!%p192_p9), 0   ;;  %s1312_s17 = sshll.u32 (!%p192_p9), %s1737_s22, 3 }
   0xe   : > { %195 = sbr.rel (%p192_p9) target bundleno = 857 (0x359), region = 40  ;;  %486 = vmatprep.mubr.bf16.mxu0 (!%p192_p9), %v1682_v2  ;;  %559 = vmatprep.mubr.bf16.mxu1 (!%p192_p9), %v1682_v2  ;;  %v1510_v3 = vld [vmem:[%s2219_s1] ss:$16 sps:$4 sm:$0xff] (!%p192_p9)   ;;  %v1511_v4 = vld [vmem:[%s2219_s1 + $0x8] ss:$16 sps:$4 sm:$0xff] (!%p192_p9)   ;;  %p220_p10 = scmp.lt.s32.totalorder (!%p192_p9), %s1312_s17, 15 }
   0xf   : > { %454 = vmatprep.subr.bf16.mxu0 (!%p192_p9), %v1506_v0  ;;  %527 = vmatprep.subr.bf16.mxu1 (!%p192_p9), %v1508_v1  ;;  %v1512_v5 = vld [vmem:[%s2219_s1 + $0x24] ss:$16 sps:$4 sm:$0xff] (!%p192_p9)   ;;  %v1514_v6 = vld [vmem:[%s2219_s1 + $0x2c] ss:$16 sps:$4 sm:$0xff] (!%p192_p9)   ;;  %v1516_v7 = vld [vmem:[%s2219_s1 + $0x20] ss:$16 sps:$4 sm:$0xff] (!%p192_p9)  }
  0x10   : > { %455 = vmatpush1.bf16.msra.mxu0 (!%p192_p9), %v1510_v3  ;;  %528 = vmatpush1.bf16.msra.mxu1 (!%p192_p9), %v1511_v4  ;;  %v1517_v8 = vld [vmem:[%s2219_s1 + $0x28] ss:$16 sps:$4 sm:$0xff] (!%p192_p9)   ;;  %v1518_v9 = vld [vmem:[%s2219_s1 + $0x44] ss:$16 sps:$4 sm:$0xff] (!%p192_p9)   ;;  %v1520_v10 = vld [vmem:[%s2219_s1 + $0x4c] ss:$16 sps:$4 sm:$0xff] (!%p192_p9)  }
  0x11   : > { %456 = vmatprep.subr.bf16.mxu0 (!%p192_p9), %v1512_v5  ;;  %529 = vmatprep.subr.bf16.mxu1 (!%p192_p9), %v1514_v6  ;;  %v1522_v11 = vld [vmem:[%s2219_s1 + $0x40] ss:$16 sps:$4 sm:$0xff] (!%p192_p9)   ;;  %v1523_v12 = vld [vmem:[%s2219_s1 + $0x48] ss:$16 sps:$4 sm:$0xff] (!%p192_p9)   ;;  %v1524_v13 = vld [vmem:[%s2219_s1 + $0x64] ss:$16 sps:$4 sm:$0xff] (!%p192_p9)  }
  0x12   : > { %v1526_v14 = vld [vmem:[%s2219_s1 + $0x6c] ss:$16 sps:$4 sm:$0xff] (!%p192_p9)   ;;  %v1528_v15 = vld [vmem:[%s2219_s1 + $0x60] ss:$16 sps:$4 sm:$0xff] (!%p192_p9)   ;;  %v1529_v16 = vld [vmem:[%s2219_s1 + $0x68] ss:$16 sps:$4 sm:$0xff] (!%p192_p9)  }
  0x13   : > { %v1530_v17 = vld [vmem:[%s2219_s1 + $0x84] ss:$16 sps:$4 sm:$0xff] (!%p192_p9)   ;;  %v1532_v18 = vld [vmem:[%s2219_s1 + $0x8c] ss:$16 sps:$4 sm:$0xff] (!%p192_p9)   ;;  %v1534_v19 = vld [vmem:[%s2219_s1 + $0x80] ss:$16 sps:$4 sm:$0xff] (!%p192_p9)  }
  0x14   : > { %457 = vmatpush1.bf16.msra.mxu0 (!%p192_p9), %v1516_v7  ;;  %530 = vmatpush1.bf16.msra.mxu1 (!%p192_p9), %v1517_v8  ;;  %v1535_v20 = vld [vmem:[%s2219_s1 + $0x88] ss:$16 sps:$4 sm:$0xff] (!%p192_p9)   ;;  %v1536_v21 = vld [vmem:[%s2219_s1 + $0xa4] ss:$16 sps:$4 sm:$0xff] (!%p192_p9)   ;;  %v1538_v22 = vld [vmem:[%s2219_s1 + $0xac] ss:$16 sps:$4 sm:$0xff] (!%p192_p9)  }
  0x15   : > { %458 = vmatprep.subr.bf16.mxu0 %v1518_v9  ;;  %531 = vmatprep.subr.bf16.mxu1 %v1520_v10  ;;  %s2231_s17 = smov (!%p220_p10, %s1312_s17), 15  ;;  %v1540_v23 = vld [vmem:[%s2219_s1 + $0xa0] ss:$16 sps:$4 sm:$0xff]   ;;  %v1541_v24 = vld [vmem:[%s2219_s1 + $0xa8] ss:$16 sps:$4 sm:$0xff]   ;;  %s1383_s30 = sshll.u32 %s1737_s22, 10 }
  0x16   : > { %s1313_s7 = sshll.u32 %s2231_s17, 3  ;;  %v1542_v25 = vld [vmem:[%s2219_s1 + $0xc4] ss:$16 sps:$4 sm:$0xff]   ;;  %v1544_v26 = vld [vmem:[%s2219_s1 + $0xcc] ss:$16 sps:$4 sm:$0xff]   ;;  %s216_s17 = sand.u32 1, %s1672_s19  }
  0x17   : > { %v1546_v27 = vld [vmem:[%s2219_s1 + $0xc0] ss:$16 sps:$4 sm:$0xff]   ;;  %v1547_v28 = vld [vmem:[%s2219_s1 + $0xc8] ss:$16 sps:$4 sm:$0xff]   ;;  %s1854_s23 = scalar_lea.vmem %s2218_s0, %s1313_s7  ;;  %v1548_v29 = vld [vmem:[%s2219_s1 + $0xe4] ss:$16 sps:$4 sm:$0xff]   ;;  %s2169_s7 = scalar_lea.hbm %s2223_s5, %s1383_s30 }
  0x18   : > { %459 = vmatpush1.bf16.msra.mxu0 %v1522_v11  ;;  %532 = vmatpush1.bf16.msra.mxu1 %v1523_v12  ;;  %v1550_v30 = vld [vmem:[%s2219_s1 + $0xec] ss:$16 sps:$4 sm:$0xff]   ;;  %v1552_v31 = vld [vmem:[%s2219_s1 + $0xe0] ss:$16 sps:$4 sm:$0xff]   ;;  %v1553_v32 = vld [vmem:[%s2219_s1 + $0xe8] ss:$16 sps:$4 sm:$0xff]  }
  0x19   : > { %460 = vmatprep.subr.bf16.mxu0 %v1524_v13  ;;  %533 = vmatprep.subr.bf16.mxu1 %v1526_v14  ;;  %v1869_v33 = vld [vmem:[%s1854_s23] sm:$0xff]  ;;  %v1872_v34 = vld [vmem:[%s1854_s23 + $0x8] sm:$0xff]  ;;  %v1892_v41 = vld [vmem:[%s1854_s23 + $0x10] sm:$0xff]  ;;  %v274_v13 = vlaneseq  ;;  %s1311_s25 = sshll.u32 %s216_s17, 6  ;;  %s2177_s22 = scalar_lea.sflag [#allocation3], %s216_s17 }
  0x1a   : > { %v1554_v35 = vld [vmem:[%s2221_s3 + $0x40] sm:$0xff]   ;;  %v236_v37 = vpack.c.bf16 %v1872_v34, %v1869_v33  ;;  %v1558_v40 = vld [vmem:[%s2221_s3 + $0x48] sm:$0xff]   ;;  %v1895_v42 = vld [vmem:[%s1854_s23 + $0x18] sm:$0xff]  ;;  %s2136_s26 = scalar_lea.vmem [#allocation2], %s1311_s25  ;;  %s1683_s11 = smov [#allocation2]  }
  0x1b   : > { %v1556_v36 = vld [vmem:[%s2221_s3 + $0xc0] sm:$0xff]   ;;  %v1560_v43 = vld [vmem:[%s2221_s3 + $0xc8] sm:$0xff]   ;;  %v1562_v46 = vld [vmem:[%s2221_s3 + $0x50] sm:$0xff]   ;;  %v237_v48 = vpack.c.bf16 %v1895_v42, %v1892_v41  ;;  %v2002_v14 = vshrl.u32 %v274_v13, 7  ;;  %s1245_s6 = sshll.u32 %s2136_s26, 4  ;;  %s2171_s6 = int_to_ptr.vmem [resolvable:$true] %s1245_s6 }
  0x1c   : > { %461 = vmatpush1.bf16.msra.mxu0 %v1528_v15  ;;  %534 = vmatpush1.bf16.msra.mxu1 %v1529_v16  ;;  %v1555_v38 = vld [vmem:[%s2221_s3] sm:$0xff]   ;;  %v1559_v44 = vld [vmem:[%s2221_s3 + $0x8] sm:$0xff]   ;;  %v1564_v47 = vld [vmem:[%s2221_s3 + $0xd0] sm:$0xff]   ;;  %s1618_s10 = scalar_lea.vmem %s2171_s6, 1024 }
  0x1d   : > { %462 = vmatprep.subr.bf16.mxu0 %v1530_v17  ;;  %535 = vmatprep.subr.bf16.mxu1 %v1532_v18  ;;  %v1557_v39 = vld [vmem:[%s2221_s3 + $0x80] sm:$0xff]   ;;  %v1561_v45 = vld [vmem:[%s2221_s3 + $0x88] sm:$0xff]   ;;  %v1563_v49 = vld [vmem:[%s2221_s3 + $0x10] sm:$0xff]   ;;  %v276_v15 = vsub.s32 0, %v2002_v14  ;;  %v284_v16 = vsub.s32 2, %v2002_v14  ;;  %v280_v18 = vsub.s32 1, %v2002_v14  ;;  %p1619_p11 = scmp.ne.s32.totalorder %s2171_s6, %s1618_s10 }
  0x1e   : > { %v1565_v50 = vld [vmem:[%s2221_s3 + $0x90] sm:$0xff]   ;;  %v1566_v51 = vld [vmem:[%s2221_s3 + $0x58] sm:$0xff]   ;;  %v1926_v52 = vld [vmem:[%s1854_s23 + $0x20] sm:$0xff] }
  0x1f   : > { %v1929_v53 = vld [vmem:[%s1854_s23 + $0x28] sm:$0xff]  ;;  %v1568_v54 = vld [vmem:[%s2221_s3 + $0xd8] sm:$0xff]   ;;  %v1570_v57 = vld [vmem:[%s2221_s3 + $0x60] sm:$0xff]   ;;  %p1620_p12 = pnand %p1619_p11, %p1754_p5 }
  0x20   : > { %463 = vmatpush1.bf16.msra.mxu0 %v1534_v19  ;;  %536 = vmatpush1.bf16.msra.mxu1 %v1535_v20  ;;  %v1567_v55 = vld [vmem:[%s2221_s3 + $0x18] sm:$0xff]   ;;  %v1572_v58 = vld [vmem:[%s2221_s3 + $0xe0] sm:$0xff]   ;;  %v238_v59 = vpack.c.bf16 %v1929_v53, %v1926_v52  ;;  %v1574_v62 = vld [vmem:[%s2221_s3 + $0x68] sm:$0xff]   ;;  %v288_v19 = vsub.s32 3, %v2002_v14 }
  0x21   : > { %464 = vmatprep.subr.bf16.mxu0 %v1536_v21  ;;  %537 = vmatprep.subr.bf16.mxu1 %v1538_v22  ;;  %v1569_v56 = vld [vmem:[%s2221_s3 + $0x98] sm:$0xff]   ;;  %v1571_v60 = vld [vmem:[%s2221_s3 + $0x20] sm:$0xff]   ;;  %v1576_v63 = vld [vmem:[%s2221_s3 + $0xe8] sm:$0xff]   ;;  %p1621_p13 = pneg %p1620_p12 }
  0x22   : > { %v1573_v61 = vld [vmem:[%s2221_s3 + $0xa0] sm:$0xff]   ;;  %v1963_v0 = vld [vmem:[%s1854_s23 + $0x30] sm:$0xff]  ;;  %v1966_v1 = vld [vmem:[%s1854_s23 + $0x38] sm:$0xff]  ;;  %s1622_s23 = sshll.u32 %s1683_s11, 4  ;;  %s1623_s23 = int_to_ptr.vmem [resolvable:$false] %s1622_s23 }
  0x23   : > { %v1575_v3 = vld [vmem:[%s2221_s3 + $0x28] sm:$0xff]   ;;  %v239_v4 = vpack.c.bf16 %v1966_v1, %v1963_v0  ;;  %v1580_v6 = vld [vmem:[%s2221_s3 + $0xf0] sm:$0xff]   ;;  %v1582_v9 = vld [vmem:[%s2221_s3 + $0x78] sm:$0xff]   ;;  %s1624_s12 = scalar_lea.vmem %s1623_s23, 2048  ;;  %p1625_p0 = scmp.lt.s32.totalorder %s2171_s6, %s1623_s23 }
  0x24   : > { %465 = vmatpush1.bf16.msra.mxu0 %v1540_v23  ;;  %538 = vmatpush1.bf16.msra.mxu1 %v1541_v24  ;;  %v1577_v5 = vld [vmem:[%s2221_s3 + $0xa8] sm:$0xff]   ;;  %v1579_v7 = vld [vmem:[%s2221_s3 + $0x30] sm:$0xff]   ;;  %v1584_v10 = vld [vmem:[%s2221_s3 + $0xf8] sm:$0xff]   ;;  %p1626_p1 = scmp.lt.s32.totalorder %s1624_s12, %s1618_s10 }
  0x25   : > { %466 = vmatprep.subr.bf16.mxu0 %v1542_v25  ;;  %539 = vmatprep.subr.bf16.mxu1 %v1544_v26  ;;  %v1581_v8 = vld [vmem:[%s2221_s3 + $0xb0] sm:$0xff]   ;;  %v1583_v11 = vld [vmem:[%s2221_s3 + $0x38] sm:$0xff]   ;;  %v272_v17 = vld [vmem:[%s2220_s2] sm:$0xf] }
  0x26   : > { %v1585_v12 = vld [vmem:[%s2221_s3 + $0xb8] sm:$0xff]   ;;  %v2013_v20 = vrot.slane %v272_v17, %v276_v15  ;;  %v2017_v21 = vrot.slane %v272_v17, %v284_v16  ;;  %v2021_v22 = vrot.slane %v272_v17, %v280_v18  ;;  %v2023_v23 = vrot.slane %v272_v17, %v288_v19  ;;  %p1627_p2 = por %p1626_p1, %p1625_p0 }
  0x28   : > { %467 = vmatpush1.bf16.msra.mxu0 %v1546_v27  ;;  %540 = vmatpush1.bf16.msra.mxu1 %v1547_v28  ;;  %p1628_p3 = pnand %p1627_p2, %p1621_p13 }
  0x29   : > { %468 = vmatprep.subr.bf16.mxu0 %v1548_v29  ;;  %541 = vmatprep.subr.bf16.mxu1 %v1550_v30 }
  0x2c   : > { %469 = vmatpush1.bf16.msra.mxu0 %v1552_v31  ;;  %542 = vmatpush1.bf16.msra.mxu1 %v1553_v32 }
  0x2d   : > { %1384 = vmatprep.subr.bf16.mxu0 %v1554_v35  ;;  %1424 = vmatprep.subr.bf16.mxu1 %v1556_v36 }
  0x2f   : > { %487 = vmatmul.mubr.bf16.vlgmr.msra.gmra.mrb[0].mxu0 %v236_v37  ;;  %560 = vmatmul.mubr.bf16.vlgmr.msra.gmra.mrb[0].mxu1 %v236_v37 }
  0x30   : > { %496 = vmatprep.mubr.bf16.mxu0 %v1682_v2  ;;  %569 = vmatprep.mubr.bf16.mxu1 %v1682_v2 }
  0x31   : > { %1385 = vmatpush3.bf16.msra.mxu0 %v1555_v38  ;;  %1425 = vmatpush3.bf16.msra.mxu1 %v1557_v39 }
  0x32   : > { %1386 = vmatprep.subr.bf16.mxu0 %v1558_v40  ;;  %1426 = vmatprep.subr.bf16.mxu1 %v1560_v43 }
  0x35   : > { %1387 = vmatpush3.bf16.msra.mxu0 %v1559_v44  ;;  %1427 = vmatpush3.bf16.msra.mxu1 %v1561_v45 }
  0x36   : > { %1388 = vmatprep.subr.bf16.mxu0 %v1562_v46  ;;  %1428 = vmatprep.subr.bf16.mxu1 %v1564_v47 }
  0x37   : > { %497 = vmatmul.mubr.bf16.gmra.mrb[4].mxu0 %v237_v48  ;;  %570 = vmatmul.mubr.bf16.gmra.mrb[4].mxu1 %v237_v48 }
  0x38   : > { %506 = vmatprep.mubr.bf16.mxu0 %v1682_v2  ;;  %579 = vmatprep.mubr.bf16.mxu1 %v1682_v2 }
  0x39   : > { %1389 = vmatpush3.bf16.msra.mxu0 %v1563_v49  ;;  %1429 = vmatpush3.bf16.msra.mxu1 %v1565_v50 }
  0x3a   : > { %1390 = vmatprep.subr.bf16.mxu0 %v1566_v51  ;;  %1430 = vmatprep.subr.bf16.mxu1 %v1568_v54 }
  0x3d   : > { %1391 = vmatpush3.bf16.msra.mxu0 %v1567_v55  ;;  %1431 = vmatpush3.bf16.msra.mxu1 %v1569_v56 }
  0x3e   : > { %1392 = vmatprep.subr.bf16.mxu0 %v1570_v57  ;;  %1432 = vmatprep.subr.bf16.mxu1 %v1572_v58 }
  0x3f   : > { %507 = vmatmul.mubr.bf16.gmra.mrb[8].mxu0 %v238_v59  ;;  %580 = vmatmul.mubr.bf16.gmra.mrb[8].mxu1 %v238_v59 }
  0x40   : > { %516 = vmatprep.mubr.bf16.mxu0 %v1682_v2  ;;  %589 = vmatprep.mubr.bf16.mxu1 %v1682_v2  ;;  %v1578_v2 = vld [vmem:[%s2221_s3 + $0x70] sm:$0xff]  }
  0x41   : > { %1393 = vmatpush3.bf16.msra.mxu0 %v1571_v60  ;;  %1433 = vmatpush3.bf16.msra.mxu1 %v1573_v61 }
  0x42   : > { %1394 = vmatprep.subr.bf16.mxu0 %v1574_v62  ;;  %1434 = vmatprep.subr.bf16.mxu1 %v1576_v63 }
  0x45   : > { %1395 = vmatpush3.bf16.msra.mxu0 %v1575_v3  ;;  %1435 = vmatpush3.bf16.msra.mxu1 %v1577_v5 }
  0x46   : > { %1396 = vmatprep.subr.bf16.mxu0 %v1578_v2  ;;  %1436 = vmatprep.subr.bf16.mxu1 %v1580_v6 }
  0x47   : > { %517 = vmatmul.mubr.bf16.gmra.mrb[12].mxu0 %v239_v4  ;;  %590 = vmatmul.mubr.bf16.gmra.mrb[12].mxu1 %v239_v4 }
  0x49   : > { %1397 = vmatpush3.bf16.msra.mxu0 %v1579_v7  ;;  %1437 = vmatpush3.bf16.msra.mxu1 %v1581_v8 }
  0x4a   : > { %1398 = vmatprep.subr.bf16.mxu0 %v1582_v9  ;;  %1438 = vmatprep.subr.bf16.mxu1 %v1584_v10 }
  0x4d   : > { %1399 = vmatpush3.bf16.msra.mxu0 %v1583_v11  ;;  %1439 = vmatpush3.bf16.msra.mxu1 %v1585_v12 }
 0x102   : > { %v488_v24 = vpop.f32.mrb[0].mxu0  ;;  %v561_v25 = vpop.f32.mrb[0].mxu1 }
 0x103   : > { %v489_v26 = vadd.f32 %v488_v24, %v2013_v20  ;;  %v562_v27 = vadd.f32 %v561_v25, %v2017_v21  ;;  %v490_v28 = vpop.f32.mrb[1].mxu0  ;;  %v563_v29 = vpop.f32.mrb[1].mxu1 }
 0x104   : > { %v491_v30 = vadd.f32 %v490_v28, %v2021_v22  ;;  %v564_v31 = vadd.f32 %v563_v29, %v2023_v23  ;;  %v492_v32 = vpop.f32.mrb[2].mxu0  ;;  %v565_v35 = vpop.f32.mrb[2].mxu1 }
 0x105   : > { %v602_v36 = vmax.f32 %v562_v27, 0.0  ;;  %v493_v37 = vadd.f32 %v492_v32, %v2013_v20  ;;  %v566_v38 = vadd.f32 %v565_v35, %v2017_v21  ;;  %v494_v39 = vpop.f32.mrb[3].mxu0  ;;  %v567_v40 = vpop.f32.mrb[3].mxu1  ;;  %v600_v46 = vmax.f32 %v489_v26, 0.0 }
 0x106   : > { %v603_v43 = vmax.f32 %v564_v31, 0.0  ;;  %v495_v44 = vadd.f32 %v494_v39, %v2021_v22  ;;  %v568_v45 = vadd.f32 %v567_v40, %v2023_v23  ;;  %v601_v49 = vmax.f32 %v491_v30, 0.0 }
 0x107   : > { %v604_v47 = vmax.f32 %v493_v37, 0.0  ;;  %v606_v48 = vmax.f32 %v566_v38, 0.0 }
 0x108   : > { %v605_v50 = vmax.f32 %v495_v44, 0.0  ;;  %v607_v51 = vmax.f32 %v568_v45, 0.0 }
 0x109   : > { %v632_v54 = vpack.c.bf16 %v604_v47, %v600_v46  ;;  %v634_v55 = vpack.c.bf16 %v606_v48, %v602_v36 }
 0x10a   : > { %v633_v56 = vpack.c.bf16 %v605_v50, %v601_v49  ;;  %v635_v57 = vpack.c.bf16 %v607_v51, %v603_v43  ;;  %v498_v58 = vpop.f32.mrb[4].mxu0  ;;  %v571_v59 = vpop.f32.mrb[4].mxu1 }
 0x10b   : > { %v499_v60 = vadd.f32 %v498_v58, %v2013_v20  ;;  %v572_v61 = vadd.f32 %v571_v59, %v2017_v21  ;;  %v500_v62 = vpop.f32.mrb[5].mxu0  ;;  %v573_v63 = vpop.f32.mrb[5].mxu1 }
 0x10c   : > { %v501_v3 = vadd.f32 %v500_v62, %v2021_v22  ;;  %v574_v4 = vadd.f32 %v573_v63, %v2023_v23  ;;  %v502_v5 = vpop.f32.mrb[6].mxu0  ;;  %v575_v2 = vpop.f32.mrb[6].mxu1  ;;  %940 = vmatprep.mubr.bf16.mxu0 %v633_v56  ;;  %1005 = vmatprep.mubr.bf16.mxu1 %v635_v57 }
 0x10d   : > { %v610_v6 = vmax.f32 %v572_v61, 0.0  ;;  %v503_v7 = vadd.f32 %v502_v5, %v2013_v20  ;;  %v576_v8 = vadd.f32 %v575_v2, %v2017_v21  ;;  %v504_v9 = vpop.f32.mrb[7].mxu0  ;;  %v577_v10 = vpop.f32.mrb[7].mxu1  ;;  %941 = vmatmul.mubr.bf16.vlgmr.msra.gmra.mrb[16].mxu0 %v632_v54  ;;  %1006 = vmatmul.mubr.bf16.vlgmr.msra.gmra.mrb[16].mxu1 %v634_v55  ;;  %v608_v17 = vmax.f32 %v499_v60, 0.0 }
 0x10e   : > { %v611_v11 = vmax.f32 %v574_v4, 0.0  ;;  %v505_v12 = vadd.f32 %v504_v9, %v2021_v22  ;;  %v578_v13 = vadd.f32 %v577_v10, %v2023_v23  ;;  %v609_v25 = vmax.f32 %v501_v3, 0.0 }
 0x10f   : > { %v612_v19 = vmax.f32 %v503_v7, 0.0  ;;  %v614_v24 = vmax.f32 %v576_v8, 0.0 }
 0x110   : > { %v613_v26 = vmax.f32 %v505_v12, 0.0  ;;  %v615_v27 = vmax.f32 %v578_v13, 0.0 }
 0x111   : > { %v636_v28 = vpack.c.bf16 %v612_v19, %v608_v17  ;;  %v638_v29 = vpack.c.bf16 %v614_v24, %v610_v6 }
 0x112   : > { %v637_v30 = vpack.c.bf16 %v613_v26, %v609_v25  ;;  %v639_v31 = vpack.c.bf16 %v615_v27, %v611_v11  ;;  %v508_v32 = vpop.f32.mrb[8].mxu0  ;;  %v581_v35 = vpop.f32.mrb[8].mxu1 }
 0x113   : > { %v509_v36 = vadd.f32 %v508_v32, %v2013_v20  ;;  %v582_v37 = vadd.f32 %v581_v35, %v2017_v21  ;;  %v510_v38 = vpop.f32.mrb[9].mxu0  ;;  %v583_v39 = vpop.f32.mrb[9].mxu1 }
 0x114   : > { %v511_v40 = vadd.f32 %v510_v38, %v2021_v22  ;;  %v584_v43 = vadd.f32 %v583_v39, %v2023_v23  ;;  %v512_v44 = vpop.f32.mrb[10].mxu0  ;;  %v585_v45 = vpop.f32.mrb[10].mxu1  ;;  %948 = vmatprep.mubr.bf16.mxu0 %v637_v30  ;;  %1013 = vmatprep.mubr.bf16.mxu1 %v639_v31 }
 0x115   : > { %v618_v46 = vmax.f32 %v582_v37, 0.0  ;;  %v513_v47 = vadd.f32 %v512_v44, %v2013_v20  ;;  %v586_v48 = vadd.f32 %v585_v45, %v2017_v21  ;;  %v514_v49 = vpop.f32.mrb[11].mxu0  ;;  %v587_v50 = vpop.f32.mrb[11].mxu1  ;;  %949 = vmatmul.mubr.bf16.gmra.mrb[20].mxu0 %v636_v28  ;;  %1014 = vmatmul.mubr.bf16.gmra.mrb[20].mxu1 %v638_v29  ;;  %v616_v56 = vmax.f32 %v509_v36, 0.0 }
 0x116   : > { %v619_v51 = vmax.f32 %v584_v43, 0.0  ;;  %v515_v54 = vadd.f32 %v514_v49, %v2021_v22  ;;  %v588_v55 = vadd.f32 %v587_v50, %v2023_v23  ;;  %v617_v59 = vmax.f32 %v511_v40, 0.0 }
 0x117   : > { %v620_v57 = vmax.f32 %v513_v47, 0.0  ;;  %v622_v58 = vmax.f32 %v586_v48, 0.0 }
 0x118   : > { %v621_v60 = vmax.f32 %v515_v54, 0.0  ;;  %v623_v61 = vmax.f32 %v588_v55, 0.0 }
 0x119   : > { %v640_v62 = vpack.c.bf16 %v620_v57, %v616_v56  ;;  %v642_v63 = vpack.c.bf16 %v622_v58, %v618_v46 }
 0x11a   : > { %v641_v3 = vpack.c.bf16 %v621_v60, %v617_v59  ;;  %v643_v4 = vpack.c.bf16 %v623_v61, %v619_v51  ;;  %v518_v5 = vpop.f32.mrb[12].mxu0  ;;  %v591_v2 = vpop.f32.mrb[12].mxu1 }
 0x11b   : > { %v519_v6 = vadd.f32 %v518_v5, %v2013_v20  ;;  %v592_v7 = vadd.f32 %v591_v2, %v2017_v21  ;;  %v520_v8 = vpop.f32.mrb[13].mxu0  ;;  %v593_v9 = vpop.f32.mrb[13].mxu1 }
 0x11c   : > { %v521_v10 = vadd.f32 %v520_v8, %v2021_v22  ;;  %v594_v11 = vadd.f32 %v593_v9, %v2023_v23  ;;  %v522_v12 = vpop.f32.mrb[14].mxu0  ;;  %v595_v13 = vpop.f32.mrb[14].mxu1  ;;  %956 = vmatprep.mubr.bf16.mxu0 %v641_v3  ;;  %1021 = vmatprep.mubr.bf16.mxu1 %v643_v4 }
 0x11d   : > { %v626_v17 = vmax.f32 %v592_v7, 0.0  ;;  %v523_v19 = vadd.f32 %v522_v12, %v2013_v20  ;;  %v596_v24 = vadd.f32 %v595_v13, %v2017_v21  ;;  %v524_v25 = vpop.f32.mrb[15].mxu0  ;;  %v597_v26 = vpop.f32.mrb[15].mxu1  ;;  %957 = vmatmul.mubr.bf16.gmra.mrb[24].mxu0 %v640_v62  ;;  %1022 = vmatmul.mubr.bf16.gmra.mrb[24].mxu1 %v642_v63  ;;  %v624_v30 = vmax.f32 %v519_v6, 0.0  ;;  %v2060_v21 = vld [vmem:[%s2222_s4] sm:$0x7] }
 0x11e   : > { %v627_v27 = vmax.f32 %v594_v11, 0.0  ;;  %v525_v28 = vadd.f32 %v524_v25, %v2021_v22  ;;  %v598_v29 = vadd.f32 %v597_v26, %v2023_v23  ;;  %v625_v35 = vmax.f32 %v521_v10, 0.0 }
 0x11f   : > { %v628_v31 = vmax.f32 %v523_v19, 0.0  ;;  %v630_v32 = vmax.f32 %v596_v24, 0.0  ;;  %v2065_v43 = vrot.slane %v2060_v21, %v276_v15 }
 0x120   : > { %v629_v36 = vmax.f32 %v525_v28, 0.0  ;;  %v631_v37 = vmax.f32 %v598_v29, 0.0 }
 0x121   : > { %v644_v38 = vpack.c.bf16 %v628_v31, %v624_v30  ;;  %v646_v39 = vpack.c.bf16 %v630_v32, %v626_v17 }
 0x122   : > { %v645_v20 = vpack.c.bf16 %v629_v36, %v625_v35  ;;  %v647_v40 = vpack.c.bf16 %v631_v37, %v627_v27 }
 0x124   : > { %964 = vmatprep.mubr.bf16.mxu0 %v645_v20  ;;  %1029 = vmatprep.mubr.bf16.mxu1 %v647_v40 }
 0x125   : > { %965 = vmatmul.mubr.bf16.gmra.mrb[28].mxu0 %v644_v38  ;;  %1030 = vmatmul.mubr.bf16.gmra.mrb[28].mxu1 %v646_v39 }
 0x1e0   : > { %v1400_v22 = vpop.f32.mrb[16].mxu0  ;;  %v1440_v23 = vpop.f32.mrb[16].mxu1 }
 0x1e1   : > { %v1401_v44 = vpop.f32.mrb[17].mxu0  ;;  %v1441_v45 = vpop.f32.mrb[17].mxu1 }
 0x1e2   : > { %v1402_v46 = vadd.f32 %v1401_v44, %v1400_v22  ;;  %v1442_v47 = vadd.f32 %v1441_v45, %v1440_v23  ;;  %v1403_v48 = vpop.f32.mrb[18].mxu0  ;;  %v1443_v49 = vpop.f32.mrb[18].mxu1 }
 0x1e3   : > { %v1404_v50 = vpop.f32.mrb[19].mxu0  ;;  %v1444_v51 = vpop.f32.mrb[19].mxu1 }
 0x1e4   : > { %v943_v54 = vadd.f32 %v1402_v46, %v2065_v43  ;;  %v1405_v55 = vadd.f32 %v1404_v50, %v1403_v48  ;;  %v1445_v56 = vadd.f32 %v1444_v51, %v1443_v49 }
 0x1e6   : > { %v1008_v57 = vadd.f32 %v1442_v47, %v943_v54  ;;  %v946_v58 = vadd.f32 %v1405_v55, %v2065_v43 }
 0x1e8   : > { %v1011_v59 = vadd.f32 %v1445_v56, %v946_v58  ;;  %v1406_v60 = vpop.f32.mrb[20].mxu0  ;;  %v1446_v61 = vpop.f32.mrb[20].mxu1  ;;  %v2070_v15 = vadd.f32 %v1008_v57, %v1869_v33 }
 0x1e9   : > { %v1407_v62 = vpop.f32.mrb[21].mxu0  ;;  %v1447_v63 = vpop.f32.mrb[21].mxu1 }
 0x1ea   : > { %v1408_v3 = vadd.f32 %v1407_v62, %v1406_v60  ;;  %v1448_v4 = vadd.f32 %v1447_v63, %v1446_v61  ;;  %v1409_v5 = vpop.f32.mrb[22].mxu0  ;;  %v1449_v2 = vpop.f32.mrb[22].mxu1  ;;  %1046 = vadd.xlane.f32.xlu0 %v2070_v15  ;;  %v1039_v11 = vadd.f32 %v1011_v59, %v1872_v34 }
 0x1eb   : > { %v1410_v6 = vpop.f32.mrb[23].mxu0  ;;  %v1450_v7 = vpop.f32.mrb[23].mxu1 }
 0x1ec   : > { %v951_v8 = vadd.f32 %v1408_v3, %v2065_v43  ;;  %v1411_v9 = vadd.f32 %v1410_v6, %v1409_v5  ;;  %v1451_v10 = vadd.f32 %v1450_v7, %v1449_v2 }
 0x1ee   : > { %v1016_v12 = vadd.f32 %v1448_v4, %v951_v8  ;;  %v954_v33 = vadd.f32 %v1411_v9, %v2065_v43  ;;  %1048 = vadd.xlane.f32.xlu0 %v1039_v11 }
 0x1f0   : > { %v1019_v13 = vadd.f32 %v1451_v10, %v954_v33  ;;  %v1412_v17 = vpop.f32.mrb[24].mxu0  ;;  %v1452_v19 = vpop.f32.mrb[24].mxu1  ;;  %v1040_v24 = vadd.f32 %v1016_v12, %v1892_v41 }
 0x1f1   : > { %v1413_v25 = vpop.f32.mrb[25].mxu0  ;;  %v1453_v26 = vpop.f32.mrb[25].mxu1 }
 0x1f2   : > { %v1414_v27 = vadd.f32 %v1413_v25, %v1412_v17  ;;  %v1454_v28 = vadd.f32 %v1453_v26, %v1452_v19  ;;  %v1415_v29 = vpop.f32.mrb[26].mxu0  ;;  %v1455_v30 = vpop.f32.mrb[26].mxu1  ;;  %1050 = vadd.xlane.f32.xlu1 %v1040_v24  ;;  %v1041_v37 = vadd.f32 %v1019_v13, %v1895_v42 }
 0x1f3   : > { %v1416_v31 = vpop.f32.mrb[27].mxu0  ;;  %v1456_v32 = vpop.f32.mrb[27].mxu1 }
 0x1f4   : > { %v959_v34 = vadd.f32 %v1414_v27, %v2065_v43  ;;  %v1417_v35 = vadd.f32 %v1416_v31, %v1415_v29  ;;  %v1457_v36 = vadd.f32 %v1456_v32, %v1455_v30 }
 0x1f6   : > { %v1024_v38 = vadd.f32 %v1454_v28, %v959_v34  ;;  %v962_v39 = vadd.f32 %v1417_v35, %v2065_v43  ;;  %1052 = vadd.xlane.f32.xlu1 %v1041_v37 }
 0x1f8   : > { %v1027_v41 = vadd.f32 %v1457_v36, %v962_v39  ;;  %v1418_v20 = vpop.f32.mrb[28].mxu0  ;;  %v1458_v40 = vpop.f32.mrb[28].mxu1  ;;  %v1042_v22 = vadd.f32 %v1024_v38, %v1926_v52 }
 0x1f9   : > { %v1419_v23 = vpop.f32.mrb[29].mxu0  ;;  %v1459_v44 = vpop.f32.mrb[29].mxu1 }
 0x1fa   : > { %v1420_v45 = vadd.f32 %v1419_v23, %v1418_v20  ;;  %v1460_v46 = vadd.f32 %v1459_v44, %v1458_v40  ;;  %v1421_v47 = vpop.f32.mrb[30].mxu0  ;;  %v1461_v48 = vpop.f32.mrb[30].mxu1  ;;  %1054 = vadd.xlane.f32.xlu0 %v1042_v22  ;;  %v1043_v49 = vadd.f32 %v1027_v41, %v1929_v53 }
 0x1fb   : > { %v1422_v50 = vpop.f32.mrb[31].mxu0  ;;  %v1462_v42 = vpop.f32.mrb[31].mxu1 }
 0x1fc   : > { %v967_v51 = vadd.f32 %v1420_v45, %v2065_v43  ;;  %v1423_v54 = vadd.f32 %v1422_v50, %v1421_v47  ;;  %v1463_v55 = vadd.f32 %v1462_v42, %v1461_v48  ;;  %1056 = vadd.xlane.f32.xlu1 %v1043_v49 }
 0x1fe   : > { %v1032_v56 = vadd.f32 %v1460_v46, %v967_v51  ;;  %v970_v57 = vadd.f32 %v1423_v54, %v2065_v43 }
 0x200   : > { %v1035_v52 = vadd.f32 %v1463_v55, %v970_v57  ;;  %v1044_v58 = vadd.f32 %v1032_v56, %v1963_v0 }
 0x202   : > { %1058 = vadd.xlane.f32.xlu0 %v1044_v58  ;;  %v1045_v59 = vadd.f32 %v1035_v52, %v1966_v1 }
 0x204   : > { %1060 = vadd.xlane.f32.xlu1 %v1045_v59 }
 0x277   : > { %v1047_v60 = vpop.xlane.xlu0 %1046 }
 0x278   : > { %v1063_v61 = vmul.f32 0.0078125, %v1047_v60 }
 0x27a   : > { %v2087_v53 = vsub.f32 %v2070_v15, %v1063_v61 }
 0x27b   : > { %v1049_v62 = vpop.xlane.xlu0 %1048 }
 0x27c   : > { %v1064_v63 = vmul.f32 0.0078125, %v1049_v62  ;;  %v1079_v3 = vmul.f32 %v2087_v53, %v2087_v53 }
 0x27e   : > { %v2091_v4 = vsub.f32 %v1039_v11, %v1064_v63  ;;  %1087 = vadd.xlane.f32.xlu0 %v1079_v3 }
 0x27f   : > { %v1051_v43 = vpop.xlane.xlu1 %1050 }
 0x280   : > { %v1065_v5 = vmul.f32 0.0078125, %v1051_v43  ;;  %v1080_v0 = vmul.f32 %v2091_v4, %v2091_v4 }
 0x282   : > { %v2095_v1 = vsub.f32 %v1040_v24, %v1065_v5  ;;  %1089 = vadd.xlane.f32.xlu1 %v1080_v0 }
 0x283   : > { %v1053_v2 = vpop.xlane.xlu1 %1052 }
 0x284   : > { %v1066_v6 = vmul.f32 0.0078125, %v1053_v2  ;;  %v1081_v15 = vmul.f32 %v2095_v1, %v2095_v1 }
 0x286   : > { %v2099_v7 = vsub.f32 %v1041_v37, %v1066_v6  ;;  %1091 = vadd.xlane.f32.xlu0 %v1081_v15 }
 0x287   : > { %v1055_v8 = vpop.xlane.xlu0 %1054 }
 0x288   : > { %v1067_v9 = vmul.f32 0.0078125, %v1055_v8  ;;  %v1082_v10 = vmul.f32 %v2099_v7, %v2099_v7  ;;  %v2123_v8 = vrot.slane %v2060_v21, %v280_v18 }
 0x289   : > { %v1057_v11 = vpop.xlane.xlu1 %1056 }
 0x28a   : > { %v2103_v12 = vsub.f32 %v1042_v22, %v1067_v9  ;;  %v1068_v33 = vmul.f32 0.0078125, %v1057_v11  ;;  %1093 = vadd.xlane.f32.xlu1 %v1082_v10 }
 0x28c   : > { %v2105_v13 = vsub.f32 %v1043_v49, %v1068_v33  ;;  %v1083_v17 = vmul.f32 %v2103_v12, %v2103_v12 }
 0x28e   : > { %1095 = vadd.xlane.f32.xlu0 %v1083_v17  ;;  %v1084_v19 = vmul.f32 %v2105_v13, %v2105_v13  ;;  %v2128_v17 = vrot.slane %v2060_v21, %v284_v16 }
 0x28f   : > { %v1059_v24 = vpop.xlane.xlu0 %1058 }
 0x290   : > { %v1069_v25 = vmul.f32 0.0078125, %v1059_v24  ;;  %1097 = vadd.xlane.f32.xlu1 %v1084_v19 }
 0x291   : > { %v1061_v26 = vpop.xlane.xlu1 %1060 }
 0x292   : > { %v2111_v27 = vsub.f32 %v1044_v58, %v1069_v25  ;;  %v1070_v28 = vmul.f32 0.0078125, %v1061_v26 }
 0x294   : > { %v2113_v29 = vsub.f32 %v1045_v59, %v1070_v28  ;;  %v1085_v30 = vmul.f32 %v2111_v27, %v2111_v27 }
 0x296   : > { %1099 = vadd.xlane.f32.xlu0 %v1085_v30  ;;  %v1086_v31 = vmul.f32 %v2113_v29, %v2113_v29 }
 0x298   : > { %1101 = vadd.xlane.f32.xlu1 %v1086_v31 }
 0x30b   : > { %v1088_v32 = vpop.xlane.xlu0 %1087 }
 0x30c   : > { %v1103_v34 = vmul.f32 0.007874016, %v1088_v32 }
 0x30e   : > { %1586 = vrsqrt.f32 %v1103_v34  ;;  %vm1113_vm0 = vcmp.eq.f32.partialorder %v1103_v34, inf  ;;  %v1116_v22 = vand.u32 2147483648, %v1103_v34  ;;  %vm1115_vm1 = vcmp.eq.f32.partialorder %v1103_v34, 0.0 }
 0x30f   : > { %v1090_v35 = vpop.xlane.xlu1 %1089 }
 0x310   : > { %v1104_v36 = vmul.f32 0.007874016, %v1090_v35 }
 0x312   : > { %1588 = vrsqrt.f32 %v1104_v36  ;;  %vm1120_vm2 = vcmp.eq.f32.partialorder %v1104_v36, inf  ;;  %v1123_v42 = vand.u32 2147483648, %v1104_v36  ;;  %vm1122_vm3 = vcmp.eq.f32.partialorder %v1104_v36, 0.0 }
 0x313   : > { %v1092_v37 = vpop.xlane.xlu0 %1091 }
 0x314   : > { %v1105_v38 = vmul.f32 0.007874016, %v1092_v37 }
 0x316   : > { %1590 = vrsqrt.f32 %v1105_v38  ;;  %vm1127_vm4 = vcmp.eq.f32.partialorder %v1105_v38, inf  ;;  %v1130_v58 = vand.u32 2147483648, %v1105_v38  ;;  %vm1129_vm5 = vcmp.eq.f32.partialorder %v1105_v38, 0.0 }
 0x317   : > { %v1094_v39 = vpop.xlane.xlu1 %1093 }
 0x318   : > { %v1587_v41 = vpop.eup %1586  ;;  %v1106_v20 = vmul.f32 0.007874016, %v1094_v39 }
 0x319   : > { %v1112_v40 = vmul.f32 %v1587_v41, %v1103_v34 }
 0x31a   : > { %1592 = vrsqrt.f32 %v1106_v20  ;;  %vm1134_vm6 = vcmp.eq.f32.partialorder %v1106_v20, inf  ;;  %v1137_v0 = vand.u32 2147483648, %v1106_v20  ;;  %vm1136_vm7 = vcmp.eq.f32.partialorder %v1106_v20, 0.0 }
 0x31b   : > { %v1114_v23 = vsel %vm1113_vm0, %v1103_v34, %v1112_v40  ;;  %v1096_v44 = vpop.xlane.xlu0 %1095 }
 0x31c   : > { %v1589_v45 = vpop.eup %1588  ;;  %v1117_v46 = vsel %vm1115_vm1, %v1116_v22, %v1114_v23  ;;  %v1107_v47 = vmul.f32 0.007874016, %v1096_v44 }
 0x31d   : > { %v1167_v48 = vadd.f32 1e-06, %v1117_v46  ;;  %v1119_v49 = vmul.f32 %v1589_v45, %v1104_v36  ;;  %v1098_v50 = vpop.xlane.xlu1 %1097 }
 0x31e   : > { %1594 = vrsqrt.f32 %v1107_v47  ;;  %v1108_v54 = vmul.f32 0.007874016, %v1098_v50  ;;  %vm1141_vm8 = vcmp.eq.f32.partialorder %v1107_v47, inf  ;;  %v1144_v24 = vand.u32 2147483648, %v1107_v47 }
 0x31f   : > { %1596 = vrcp.f32 %v1167_v48  ;;  %v1121_v51 = vsel %vm1120_vm2, %v1104_v36, %v1119_v49  ;;  %vm1143_vm9 = vcmp.eq.f32.partialorder %v1107_v47, 0.0 }
 0x320   : > { %v1591_v55 = vpop.eup %1590  ;;  %v1124_v56 = vsel %vm1122_vm3, %v1123_v42, %v1121_v51  ;;  %1598 = vrsqrt.f32 %v1108_v54  ;;  %vm1148_vm10 = vcmp.eq.f32.partialorder %v1108_v54, inf  ;;  %v1151_v14 = vand.u32 2147483648, %v1108_v54 }
 0x321   : > { %v1168_v57 = vadd.f32 1e-06, %v1124_v56  ;;  %v1126_v52 = vmul.f32 %v1591_v55, %v1105_v38  ;;  %vm1150_vm11 = vcmp.eq.f32.partialorder %v1108_v54, 0.0 }
 0x323   : > { %1600 = vrcp.f32 %v1168_v57  ;;  %v1128_v59 = vsel %vm1127_vm4, %v1105_v38, %v1126_v52  ;;  %v1100_v60 = vpop.xlane.xlu0 %1099 }
 0x324   : > { %v1593_v61 = vpop.eup %1592  ;;  %v1131_v62 = vsel %vm1129_vm5, %v1130_v58, %v1128_v59  ;;  %v1109_v63 = vmul.f32 0.007874016, %v1100_v60 }
 0x325   : > { %v1169_v3 = vadd.f32 1e-06, %v1131_v62  ;;  %v1133_v43 = vmul.f32 %v1593_v61, %v1106_v20  ;;  %v1102_v5 = vpop.xlane.xlu1 %1101 }
 0x326   : > { %1602 = vrsqrt.f32 %v1109_v63  ;;  %v1110_v6 = vmul.f32 0.007874016, %v1102_v5  ;;  %vm1155_vm12 = vcmp.eq.f32.partialorder %v1109_v63, inf  ;;  %vm1157_vm13 = vcmp.eq.f32.partialorder %v1109_v63, 0.0 }
 0x327   : > { %1604 = vrcp.f32 %v1169_v3  ;;  %v1135_v2 = vsel %vm1134_vm6, %v1106_v20, %v1133_v43  ;;  %v1158_v20 = vand.u32 2147483648, %v1109_v63 }
 0x328   : > { %v1595_v15 = vpop.eup %1594  ;;  %v1138_v9 = vsel %vm1136_vm7, %v1137_v0, %v1135_v2  ;;  %1606 = vrsqrt.f32 %v1110_v6  ;;  %vm1162_vm14 = vcmp.eq.f32.partialorder %v1110_v6, inf  ;;  %v1165_v48 = vand.u32 2147483648, %v1110_v6 }
 0x329   : > { %v1597_v10 = vpop.eup %1596  ;;  %v1170_v11 = vadd.f32 1e-06, %v1138_v9  ;;  %v1140_v33 = vmul.f32 %v1595_v15, %v1107_v47  ;;  %vm1164_vm15 = vcmp.eq.f32.partialorder %v1110_v6, 0.0 }
 0x32a   : > { %v1191_v19 = vmul.f32 %v1597_v10, %v2087_v53  ;;  %v1599_v25 = vpop.eup %1598 }
 0x32b   : > { %1608 = vrcp.f32 %v1170_v11  ;;  %v1142_v18 = vsel %vm1141_vm8, %v1107_v47, %v1140_v33  ;;  %v1147_v30 = vmul.f32 %v1599_v25, %v1108_v54 }
 0x32c   : > { %v1203_v26 = vmul.f32 %v2123_v8, %v1191_v19  ;;  %v1145_v28 = vsel %vm1143_vm9, %v1144_v24, %v1142_v18 }
 0x32d   : > { %v1601_v31 = vpop.eup %1600  ;;  %v1171_v32 = vadd.f32 1e-06, %v1145_v28  ;;  %v1149_v34 = vsel %vm1148_vm10, %v1108_v54, %v1147_v30 }
 0x32e   : > { %v1215_v16 = vadd.f32 %v2128_v17, %v1203_v26  ;;  %v1192_v21 = vmul.f32 %v1601_v31, %v2091_v4  ;;  %v1152_v53 = vsel %vm1150_vm11, %v1151_v14, %v1149_v34 }
 0x32f   : > { %1610 = vrcp.f32 %v1171_v32  ;;  %v1172_v37 = vadd.f32 1e-06, %v1152_v53 }
 0x330   : > { %v1603_v35 = vpop.eup %1602  ;;  %1223 = vst [vmem:[%s2136_s26] sm:$0xff] %v1215_v16  ;;  %v1204_v36 = vmul.f32 %v2123_v8, %v1192_v21 }
 0x331   : > { %v1605_v38 = vpop.eup %1604  ;;  %v1154_v39 = vmul.f32 %v1603_v35, %v1109_v63  ;;  %1612 = vrcp.f32 %v1172_v37 }
 0x332   : > { %v1216_v41 = vadd.f32 %v2128_v17, %v1204_v36  ;;  %v1193_v4 = vmul.f32 %v1605_v38, %v2095_v1  ;;  %v1607_v40 = vpop.eup %1606 }
 0x333   : > { %v1156_v22 = vsel %vm1155_vm12, %v1109_v63, %v1154_v39  ;;  %v1161_v45 = vmul.f32 %v1607_v40, %v1110_v6 }
 0x334   : > { %1224 = vst [vmem:[%s2136_s26 + $0x8] sm:$0xff] %v1216_v41  ;;  %v1205_v23 = vmul.f32 %v2123_v8, %v1193_v4  ;;  %v1159_v44 = vsel %vm1157_vm13, %v1158_v20, %v1156_v22 }
 0x335   : > { %v1609_v46 = vpop.eup %1608  ;;  %v1173_v47 = vadd.f32 1e-06, %v1159_v44  ;;  %v1163_v50 = vsel %vm1162_vm14, %v1110_v6, %v1161_v45 }
 0x336   : > { %v1217_v49 = vadd.f32 %v2128_v17, %v1205_v23  ;;  %v1194_v1 = vmul.f32 %v1609_v46, %v2099_v7  ;;  %v1166_v42 = vsel %vm1164_vm15, %v1165_v48, %v1163_v50 }
 0x337   : > { %1614 = vrcp.f32 %v1173_v47  ;;  %v1174_v54 = vadd.f32 1e-06, %v1166_v42 }
 0x338   : > { %1225 = vst [vmem:[%s2136_s26 + $0x10] sm:$0xff] %v1217_v49  ;;  %v1206_v51 = vmul.f32 %v2123_v8, %v1194_v1 }
 0x339   : > { %v1611_v55 = vpop.eup %1610  ;;  %1616 = vrcp.f32 %v1174_v54 }
 0x33a   : > { %v1218_v56 = vadd.f32 %v2128_v17, %v1206_v51  ;;  %v1195_v57 = vmul.f32 %v1611_v55, %v2103_v12 }
 0x33b   : > { %v1613_v52 = vpop.eup %1612 }
 0x33c   : > { %1226 = vst [vmem:[%s2136_s26 + $0x18] sm:$0xff] %v1218_v56  ;;  %v1207_v7 = vmul.f32 %v2123_v8, %v1195_v57  ;;  %v1196_v58 = vmul.f32 %v1613_v52, %v2105_v13 }
 0x33e   : > { %v1219_v59 = vadd.f32 %v2128_v17, %v1207_v7  ;;  %v1208_v60 = vmul.f32 %v2123_v8, %v1196_v58 }
 0x340   : > { %1227 = vst [vmem:[%s2136_s26 + $0x20] sm:$0xff] %v1219_v59  ;;  %v1220_v12 = vadd.f32 %v2128_v17, %v1208_v60 }
 0x341   : > { %v1615_v61 = vpop.eup %1614 }
 0x342   : > { %v1197_v62 = vmul.f32 %v1615_v61, %v2111_v27  ;;  %1228 = vst [vmem:[%s2136_s26 + $0x28] sm:$0xff] %v1220_v12 }
 0x343   : > { %v1617_v63 = vpop.eup %1616 }
 0x344   : > { %v1209_v3 = vmul.f32 %v2123_v8, %v1197_v62  ;;  %v1198_v43 = vmul.f32 %v1617_v63, %v2113_v29 }
 0x346   : > { %v1221_v13 = vadd.f32 %v2128_v17, %v1209_v3  ;;  %v1210_v5 = vmul.f32 %v2123_v8, %v1198_v43 }
 0x348   : > { %1229 = vst [vmem:[%s2136_s26 + $0x30] sm:$0xff] %v1221_v13  ;;  %v1222_v27 = vadd.f32 %v2128_v17, %v1210_v5 }
 0x34a   : > { %1230 = vst [vmem:[%s2136_s26 + $0x38] sm:$0xff] %v1222_v27 }
 0x34b   : > { %1631 = shalt.err (!%p1628_p3)
}
 0x34c   : > { %s1632_s13 = scalar_lea.hbm %s2169_s7, 1024  ;;  %s1636_s16 = scalar_lea.hbm %s2223_s5, 2048 }
 0x34d   : > { %p1633_p4 = scmp.ne.s32.totalorder %s2169_s7, %s1632_s13  ;;  %p1637_p9 = scmp.lt.u32.totalorder %s2169_s7, %s2223_s5 }
 0x34e   : > { %p1638_p10 = scmp.lt.u32.totalorder %s1636_s16, %s1632_s13  ;;  %p1640_p12 = scmp.lt.u32.totalorder %s1632_s13, %s2169_s7 }
 0x34f   : > { %p1634_p7 = pnand %p1633_p4, %p1754_p5 }
 0x350   : > { %p1639_p11 = por %p1638_p10, %p1637_p9 }
 0x351   : > { %p1635_p8 = pneg %p1634_p7 }
 0x352   : > { %p1641_p13 = por %p1640_p12, %p1639_p11 }
 0x354   : > { %p1642_p0 = pnand %p1641_p13, %p1635_p8 }
 0x356   : > { %1645 = shalt.err (!%p1642_p0)
}
 0x357   : > { %s1684_s26 = smov 128   ;;  %s1685_s30 = smov 8  }
 0x358   : > { %1464 = dma.vmem_to_hbm [thread:$0]  (%p1754_p5), %s2171_s6, 1024, %s2169_s7, %s2177_s22, %s1684_s26, %s1684_s26, %s1685_s30  }
 0x359 PF: > { %p1470_p1 = scmp.ge.s32.totalorder %s1680_s21, 2  ;;  %s1260_s8 = sand.u32 1, %s1668_s18  }
 0x35a   : > { %s1261_s9 = scalar_lea.sflag [#allocation3], %s1260_s8 }
 0x35b   : > { %p1467_p2 = pnand %p1470_p1, %p1758_p6 }
 0x35d   : > { %1663 = dma.done.wait (!%p1467_p2), %s1261_s9, 1024  }
 0x35e   : > { %1665 = vsyncadd (!%p1467_p2), %s1261_s9, 4294966272  ;;  %p15_p3 = scmp.ge.s32.totalorder %s1741_s24, 4   ;;  %s2226_s18 = smov %s1672_s19 }
 0x35f   : > { %s2227_s19 = smov %s1676_s20  ;;  %s2228_s20 = smov %s1752_s27 }
 0x360   : > { %s2229_s21 = smov %s1741_s24  ;;  %17 = sbr.rel (!%p15_p3) target bundleno = 3 (0x3), region = 75 }
 0x367   :  { %1266 = vsyncpa [#allocation3], 1 }
 0x368   :  { %1268 = vsyncpa [#allocation3 + $0x1], 1 }

</bundles_post_ra>
